<compile_context>
chip_gen: v7x
topology: tpu7x:2x2x1
jax: 0.10.0
libtpu: 0.0.40
codegen_flags: <defaults>
</compile_context>

<pallas_src>
import functools
import math

import numpy as np
import jax
import jax.numpy as jnp
from jax import lax
from jax.experimental import pallas as pl
from jax.experimental.pallas import tpu as pltpu

BN_EPS = 1e-5
BN_SCALE = 1.0 / math.sqrt(1.0 + BN_EPS)   # eval-mode BN with identity stats
_RNG = np.random.default_rng(0)


def _rup(x, m):
    return (x + m - 1) // m * m


def _vmem_limit(block_bytes, extra_bytes=0):
    """Explicit scoped-VMEM budget: double-buffered blocks + temporaries,
    floored at the 32 MiB default, capped at 64 MiB (v7x physical)."""
    need = 2 * block_bytes + extra_bytes + (8 << 20)
    return int(min(max(need, 32 << 20), 64 << 20))


# ---------------------------------------------------------------------------
# Tile selection: exact divisors / full dims so nothing is padded at runtime.
# ---------------------------------------------------------------------------
def _pick_tm(M):
    if M <= 512:
        return M                       # full dim -> no (8,128) constraint
    for t in range(512, 7, -8):
        if M % t == 0:
            return t
    return 512                         # generic fallback (pads); unused here


def _pick_tn(N, single_row_block):
    if N > 512:
        for t in (512, 256, 128):
            if N % t == 0:
                return t
        return N
    # Keep >= 2 parallel blocks for the v7x megacore in the small-M late layers.
    if single_row_block and N >= 256 and (N // 2) % 128 == 0:
        return N // 2
    return N


# ---------------------------------------------------------------------------
# Pallas kernel 1: full-K matmul, fused residual add + ReLU epilogue.
# Used for every 1x1 conv and for the few im2col-fallback convs.
# ---------------------------------------------------------------------------
def _matmul_kernel(*refs, act, has_res):
    if has_res:
        a_ref, b_ref, r_ref, o_ref = refs
    else:
        a_ref, b_ref, o_ref = refs
        r_ref = None
    y = jnp.dot(a_ref[...], b_ref[...], preferred_element_type=jnp.float32)
    if r_ref is not None:
        y = y + r_ref[...].astype(jnp.float32)
    if act == "relu":
        y = jnp.maximum(y, 0.0)
    o_ref[...] = y.astype(o_ref.dtype)


def matmul_res_act(a, b, residual=None, *, act="none", out_dtype=jnp.bfloat16):
    """(M,K)@(K,N) [+ residual] -> activation.  bf16 in, f32 accumulate, 2-D
    fully-parallel grid, full-K blocks, no runtime padding for this network."""
    M, K = a.shape
    _, N = b.shape
    tm = _pick_tm(M)
    tn = _pick_tn(N, single_row_block=(M <= tm))
    Mp, Np = _rup(M, tm), _rup(N, tn)       # == (M, N) for every layer here

    a = a.astype(jnp.bfloat16)
    b = b.astype(jnp.bfloat16)
    if Mp != M:
        a = jnp.pad(a, ((0, Mp - M), (0, 0)))
    if Np != N:
        b = jnp.pad(b, ((0, 0), (0, Np - N)))

    inputs = [a, b]
    in_specs = [
        pl.BlockSpec((tm, K), lambda i, j: (i, 0)),
        pl.BlockSpec((K, tn), lambda i, j: (0, j)),
    ]
    has_res = residual is not None
    if has_res:
        r = residual.astype(jnp.bfloat16)
        if Mp != M or Np != N:
            r = jnp.pad(r, ((0, Mp - M), (0, Np - N)))
        inputs.append(r)
        in_specs.append(pl.BlockSpec((tm, tn), lambda i, j: (i, j)))

    block_bytes = (tm * K + K * tn + tm * tn) * 2
    if has_res:
        block_bytes += tm * tn * 2
    cost = pl.CostEstimate(
        flops=2 * M * K * N,
        transcendentals=0,
        bytes_accessed=(M * K + K * N + M * N) * 2 + (M * N * 2 if has_res else 0),
    )

    out = pl.pallas_call(
        functools.partial(_matmul_kernel, act=act, has_res=has_res),
        out_shape=jax.ShapeDtypeStruct((Mp, Np), out_dtype),
        grid_spec=pltpu.PrefetchScalarGridSpec(
            num_scalar_prefetch=0,
            grid=(Mp // tm, Np // tn),
            in_specs=in_specs,
            out_specs=pl.BlockSpec((tm, tn), lambda i, j: (i, j)),
        ),
        compiler_params=pltpu.CompilerParams(
            dimension_semantics=("parallel", "parallel"),
            vmem_limit_bytes=_vmem_limit(block_bytes, extra_bytes=2 * tm * tn * 4)),
        cost_estimate=cost,
    )(*inputs)
    if Mp != M or Np != N:
        out = out[:M, :N]
    return out


# ---------------------------------------------------------------------------
# Pallas kernel 2: fused 3x3 / stride-1 / pad-1 convolution.
# The activation is read directly in NHWC (flattened spatial), each of the nine
# taps is a sublane roll + boundary mask + MXU matmul accumulated in f32.
# No im2col patch matrix ever touches HBM.
# ---------------------------------------------------------------------------
def _conv3x3_kernel(x_ref, w_ref, ow_ref, o_ref, *, H, W, act):
    M = H * W
    x = x_ref[0]                                       # (M, Cin) bf16
    r = lax.broadcasted_iota(jnp.int32, (M, 1), 0)     # flat output index
    ow = ow_ref[...]                                   # (M, 1) column index
    acc = jnp.zeros((M, o_ref.shape[2]), jnp.float32)
    for di in range(3):
        for dj in range(3):
            s = (di - 1) * W + (dj - 1)                # flat input shift
            xt = x if s == 0 else pltpu.roll(x, (-s) % M, 0)
            conds = []
            if di == 0:
                conds.append(r >= W)                   # row oh-1 >= 0
            elif di == 2:
                conds.append(r < (H - 1) * W)          # row oh+1 <= H-1
            if dj == 0:
                conds.append(ow >= 1)                  # col ow-1 >= 0
            elif dj == 2:
                conds.append(ow <= W - 2)              # col ow+1 <= W-1
            if conds:
                valid = conds[0]
                for c in conds[1:]:
                    valid = jnp.logical_and(valid, c)
                xt = jnp.where(valid, xt, jnp.zeros_like(xt))
            acc = acc + jnp.dot(xt, w_ref[di * 3 + dj],
                                preferred_element_type=jnp.float32)
    if act == "relu":
        acc = jnp.maximum(acc, 0.0)
    o_ref[0] = acc.astype(o_ref.dtype)


def conv3x3_s1_fused(x, w9, *, act="relu"):
    """3x3, stride 1, padding 1 conv.  x: (N,H,W,Cin) bf16, w9: (9,Cin,Cout)."""
    N, H, W, Cin = x.shape
    Cout = w9.shape[-1]
    M = H * W
    tn = min(Cout, 256)
    if N == 1 and tn == Cout and Cout >= 256:
        tn = Cout // 2                  # >= 2 parallel blocks for v7x megacore

    xf = x.reshape(N, M, Cin).astype(jnp.bfloat16)
    ow_idx = (jnp.arange(M, dtype=jnp.int32) % W).reshape(M, 1)

    block_bytes = (M * Cin + 9 * Cin * tn + M * tn) * 2 + M * 4
    extra = 3 * M * Cin * 2 + 2 * M * tn * 4            # roll temps + f32 acc
    cost = pl.CostEstimate(
        flops=2 * N * M * 9 * Cin * Cout,
        transcendentals=0,
        bytes_accessed=(N * M * Cin + 9 * Cin * Cout + N * M * Cout) * 2,
    )

    out = pl.pallas_call(
        functools.partial(_conv3x3_kernel, H=H, W=W, act=act),
        out_shape=jax.ShapeDtypeStruct((N, M, Cout), jnp.bfloat16),
        grid_spec=pltpu.PrefetchScalarGridSpec(
            num_scalar_prefetch=0,
            grid=(N, Cout // tn),
            in_specs=[
                pl.BlockSpec((1, M, Cin), lambda n, j: (n, 0, 0)),
                pl.BlockSpec((9, Cin, tn), lambda n, j: (0, 0, j)),
                pl.BlockSpec((M, 1), lambda n, j: (0, 0)),
            ],
            out_specs=pl.BlockSpec((1, M, tn), lambda n, j: (n, 0, j)),
        ),
        compiler_params=pltpu.CompilerParams(
            dimension_semantics=("parallel", "parallel"),
            vmem_limit_bytes=_vmem_limit(block_bytes, extra_bytes=extra)),
        cost_estimate=cost,
    )(xf, w9, ow_idx)
    return out.reshape(N, H, W, Cout)


# ---------------------------------------------------------------------------
# Conv wrappers (traced inside per-block jit so all glue fuses in XLA).
# ---------------------------------------------------------------------------
def conv1x1(x, w, residual=None, *, stride=1, act="none"):
    N, H, W, C = x.shape
    if stride > 1:
        x = x[:, ::stride, ::stride, :]
        H, W = x.shape[1], x.shape[2]
    cout = w.shape[-1]
    a = x.reshape(N * H * W, C)
    res = None if residual is None else residual.reshape(N * H * W, cout)
    out = matmul_res_act(a, w, residual=res, act=act)
    return out.reshape(N, H, W, cout)


def conv_im2col(x, w2d, kh, kw, *, stride, padding, act="none"):
    """Fallback KxK conv via materialised im2col + the Pallas matmul kernel.
    Only the 7x7 stem and the three stride-2 bottlenecks use this path."""
    N, H, W, C = x.shape
    xp = jnp.pad(x, ((0, 0), (padding, padding), (padding, padding), (0, 0)))
    Ho = (H + 2 * padding - kh) // stride + 1
    Wo = (W + 2 * padding - kw) // stride + 1
    cols = [xp[:, i:i + stride * Ho:stride, j:j + stride * Wo:stride, :]
            for i in range(kh) for j in range(kw)]
    a = jnp.concatenate(cols, axis=-1).reshape(N * Ho * Wo, kh * kw * C)
    out = matmul_res_act(a, w2d, act=act)
    return out.reshape(N, Ho, Wo, w2d.shape[-1])


def maxpool3x3s2(x):   # MaxPool2d(kernel=3, stride=2, padding=1), NHWC
    return lax.reduce_window(x, jnp.asarray(-jnp.inf, x.dtype), lax.max,
                             (1, 3, 3, 1), (1, 2, 2, 1),
                             [(0, 0), (1, 1), (1, 1), (0, 0)])


# ---------------------------------------------------------------------------
# Parameters: conv weights in bf16 with the eval-mode BN scale folded in.
# BN beta / running_mean are zero under the reference init, so no biases.
# ---------------------------------------------------------------------------
def conv_bn_1x1(cin, cout):
    std = math.sqrt(2.0 / cout)
    w = _RNG.normal(0.0, std, size=(cin, cout)).astype(np.float32)
    return jnp.asarray(w * BN_SCALE, jnp.bfloat16)


def conv_bn_3x3(cin, cout):
    std = math.sqrt(2.0 / (9 * cout))
    w = _RNG.normal(0.0, std, size=(3, 3, cin, cout)).astype(np.float32)
    return jnp.asarray((w * BN_SCALE).reshape(9, cin, cout), jnp.bfloat16)


def conv_bn_7x7(cin, cout):
    std = math.sqrt(2.0 / (49 * cout))
    w = _RNG.normal(0.0, std, size=(7, 7, cin, cout)).astype(np.float32)
    return jnp.asarray((w * BN_SCALE).reshape(49 * cin, cout), jnp.bfloat16)


def make_air(inplanes, planes, downsample=False):
    half = planes // 2
    p = {
        "conv1_1": conv_bn_1x1(inplanes, planes),
        # bn_concat is split per-branch (valid: gamma=1>0, beta=mean=0) and its
        # scale folded into conv1_2 / conv2_3.
        "conv1_2": conv_bn_3x3(planes, planes),
        "conv2_1": conv_bn_1x1(inplanes, half),
        "conv2_2": conv_bn_3x3(half, half),
        "conv2_3": conv_bn_3x3(half, half),
        "conv":    conv_bn_1x1(planes + half, planes * 4),
    }
    if downsample:
        p["ds"] = conv_bn_1x1(inplanes, planes * 4)
    return p


def make_att(inplanes, planes):
    # Only the live sub-blocks of AttentionBlock_{A,B,C} (see NOTE above).
    return {k: make_air(inplanes, planes)
            for k in ("pre", "block1", "block2", "pos")}


def build_params(num_classes):
    P = {"conv1": conv_bn_7x7(3, 64)}
    P["layer1"] = [make_air(64, 64, downsample=True)]
    P["att_A1"] = make_att(256, 64)
    P["layer2"] = [make_air(256, 128, downsample=True)]
    P["att_B1"] = make_att(512, 128)
    P["att_B2"] = make_att(512, 128)
    P["layer3"] = [make_air(512, 256, downsample=True)]
    P["att_C1"] = make_att(1024, 256)
    P["att_C2"] = make_att(1024, 256)
    P["att_C3"] = make_att(1024, 256)
    P["layer4"] = [make_air(1024, 512, downsample=True),
                   make_air(2048, 512), make_air(2048, 512)]
    bound = 1.0 / math.sqrt(512 * 4)
    P["fc_w"] = jnp.asarray(_RNG.uniform(-bound, bound, (512 * 4, num_classes)),
                            jnp.float32)
    P["fc_b"] = jnp.asarray(_RNG.uniform(-bound, bound, (num_classes,)),
                            jnp.float32)
    return P


# ---------------------------------------------------------------------------
# Forward passes (jit per AIR block / stem / head so glue fuses in XLA).
# ---------------------------------------------------------------------------
@functools.partial(jax.jit, static_argnames=("stride",))
def air_forward(x, p, *, stride=1):
    # branch 1: 1x1 (+BN+ReLU) -> 3x3
    b1 = conv1x1(x, p["conv1_1"], act="relu")
    if stride == 1:
        b1 = conv3x3_s1_fused(b1, p["conv1_2"], act="relu")
    else:
        w12 = p["conv1_2"]
        b1 = conv_im2col(b1, w12.reshape(-1, w12.shape[-1]), 3, 3,
                         stride=stride, padding=1, act="relu")
    # branch 2: 1x1 -> 3x3 -> 3x3
    b2 = conv1x1(x, p["conv2_1"], act="relu")
    if stride == 1:
        b2 = conv3x3_s1_fused(b2, p["conv2_2"], act="relu")
    else:
        w22 = p["conv2_2"]
        b2 = conv_im2col(b2, w22.reshape(-1, w22.shape[-1]), 3, 3,
                         stride=stride, padding=1, act="relu")
    b2 = conv3x3_s1_fused(b2, p["conv2_3"], act="relu")

    out = jnp.concatenate([b1, b2], axis=-1)
    residual = (conv1x1(x, p["ds"], stride=stride, act="none")
                if "ds" in p else x)
    return conv1x1(out, p["conv"], residual=residual, act="relu")


def att_forward(x, p):
    x = air_forward(x, p["pre"])
    x = air_forward(x, p["block1"])
    x = air_forward(x, p["block2"])
    return air_forward(x, p["pos"])


@jax.jit
def stem_forward(x_nchw, conv1_w):
    x = jnp.transpose(x_nchw, (0, 2, 3, 1)).astype(jnp.bfloat16)  # NCHW->NHWC
    x = conv_im2col(x, conv1_w, 7, 7, stride=2, padding=3, act="relu")
    return maxpool3x3s2(x)


@jax.jit
def head_forward(x, fc_w, fc_b):
    # AvgPool2d(7) over the final 7x7 map -> flatten -> Linear.
    # Tiny (1,2048)x(2048,nc) matmul: a Pallas launch is pure overhead here, so
    # it stays on XLA inside this jit.
    pooled = jnp.mean(x.astype(jnp.float32), axis=(1, 2))
    return jnp.dot(pooled, fc_w) + fc_b


def air_attention_forward(x_nchw, P):
    x = stem_forward(x_nchw, P["conv1"])
    x = air_forward(x, P["layer1"][0], stride=1)
    x = att_forward(x, P["att_A1"])
    x = air_forward(x, P["layer2"][0], stride=2)
    x = att_forward(x, P["att_B1"])
    x = att_forward(x, P["att_B2"])
    x = air_forward(x, P["layer3"][0], stride=2)
    x = att_forward(x, P["att_C1"])
    x = att_forward(x, P["att_C2"])
    x = att_forward(x, P["att_C3"])
    x = air_forward(x, P["layer4"][0], stride=2)
    x = air_forward(x, P["layer4"][1], stride=1)
    x = air_forward(x, P["layer4"][2], stride=1)
    return head_forward(x, P["fc_w"], P["fc_b"])


if __name__ == "__main__":
    num_classes = 10
    params = build_params(num_classes)
    key = jax.random.PRNGKey(0)
    # NCHW input like the PyTorch module.  224x224 is the smallest spatial size
    # consistent with the architecture: /32 downsampling must feed AvgPool2d(7)
    # with a 7x7 map for the 2048-d fc to be valid.  Batch = 1.
    x = jax.random.normal(key, (1, 3, 224, 224), dtype=jnp.float32)
    out = air_attention_forward(x, params)
    out = jax.block_until_ready(out)
    assert out.shape == (1, num_classes)
    print("KERNEL_OK")
</pallas_src>

<mosaic_0001>
module attributes {stable_mosaic.version = 11 : i64} {
  func.func @_matmul_kernel(%arg0: i32, %arg1: i32, %arg2: memref<448x147xbf16, #tpu.memory_space<vmem>>, %arg3: memref<147x64xbf16, #tpu.memory_space<vmem>>, %arg4: memref<448x64xbf16, #tpu.memory_space<vmem>>) attributes {dimension_semantics = [#tpu.dimension_semantics<parallel>, #tpu.dimension_semantics<parallel>], iteration_bounds = array<i64: 28, 1>, scalar_prefetch = 0 : i64, scratch_operands = 0 : i64, tpu.core_type = #tpu.core_type<tc>, window_params = [{transform_indices = @transform_0, window_bounds = array<i64: 448, 147>}, {transform_indices = @transform_1, window_bounds = array<i64: 147, 64>}, {transform_indices = @transform_2, window_bounds = array<i64: 448, 64>}]} {
    %c0 = arith.constant 0 : index
    %c0_0 = arith.constant 0 : index
    %0 = vector.load %arg2[%c0, %c0_0] : memref<448x147xbf16, #tpu.memory_space<vmem>>, vector<448x147xbf16>
    %c0_1 = arith.constant 0 : index
    %c0_2 = arith.constant 0 : index
    %1 = vector.load %arg3[%c0_1, %c0_2] : memref<147x64xbf16, #tpu.memory_space<vmem>>, vector<147x64xbf16>
    %cst = arith.constant dense<0.000000e+00> : vector<448x64xf32>
    %2 = tpu.matmul %0, %1, %cst {dimension_numbers = #tpu.dot_dimension_numbers<[1], [0], [0], [1], [0, 0, 1, 1], [], []>} : vector<448x147xbf16>, vector<147x64xbf16>, vector<448x64xf32> -> vector<448x64xf32>
    %cst_3 = arith.constant 0.000000e+00 : f32
    %3 = vector.broadcast %cst_3 : f32 to vector<448x64xf32>
    %4 = arith.maximumf %2, %3 : vector<448x64xf32>
    %5 = arith.truncf %4 : vector<448x64xf32> to vector<448x64xbf16>
    %c0_4 = arith.constant 0 : index
    %c0_5 = arith.constant 0 : index
    %6 = vector.load %arg4[%c0_4, %c0_5] : memref<448x64xbf16, #tpu.memory_space<vmem>>, vector<448x64xbf16>
    tpu.vector_store %arg4[%c0_4, %c0_5], %5 {strides = array<i32>} : memref<448x64xbf16, #tpu.memory_space<vmem>>, vector<448x64xbf16>,
    return
  }
  func.func @transform_0(%arg0: i32, %arg1: i32) -> (i32, i32) {
    %c0_i32 = arith.constant 0 : i32
    %c0_i32_0 = arith.constant 0 : i32
    return %arg0, %c0_i32 : i32, i32
  }
  func.func @transform_1(%arg0: i32, %arg1: i32) -> (i32, i32) {
    %c0_i32 = arith.constant 0 : i32
    %c0_i32_0 = arith.constant 0 : i32
    return %c0_i32, %arg1 : i32, i32
  }
  func.func @transform_2(%arg0: i32, %arg1: i32) -> (i32, i32) {
    %c0_i32 = arith.constant 0 : i32
    return %arg0, %arg1 : i32, i32
  }
}

</mosaic_0001>

<bundles_post_ra>
// kernel: stem_forward.1
= control target key start
LH: loop header
LB: loop body
LE: loop exit
PB: predicated region body
PF: predicated region fallthrough
CT: control target
= control target key end

     0   :  { %s1747_s9 = smov 0   ;;  %s1749_s10 = smov 0   ;;  %s2017_s0 = inlined_call_operand.vmem [shape: bf16[12544,147], index: 0, kind: input, shape index: {}]   ;;  %s2018_s1 = inlined_call_operand.vmem [shape: bf16[147,64], index: 1, kind: input, shape index: {}]   ;;  %s2019_s2 = inlined_call_operand.vmem [shape: bf16[12544,64], index: 2, kind: output, shape index: {}]  }
   0x1   :  { %s1751_s11 = smov 0  }
   0x2 LB: > { %s24_s12 = sadd.s32 1, %s1724_s10  ;;  %p1353_p0 = scmp.ge.s32.totalorder %s1728_s11, 1  ;;  %s1728_s11 = sphi %s1751_s11, %s12_s11   ;;  %s1724_s10 = sphi %s1749_s10, %s2021_s10   ;;  %s1720_s9 = sphi %s1747_s9, %s2020_s9  }
   0x3   : > { %p26_p1 = scmp.ge.s32.totalorder %s24_s12, 28  ;;  %p137_p2 = scmp.lt.s32.totalorder %s1728_s11, 29 }
   0x5   : > { %s2023_s12 = smov (%p26_p1, %s24_s12), 0  ;;  %p138_p3 = pnand %p1353_p0, %p137_p2 }
   0x6   : > { %v1612_v0 = vld [vmem:[%s2018_s1] sm:$0xff] (!%p138_p3)   ;;  %v1730_v1 = vmov (!%p138_p3), 0   ;;  %v1613_v2 = vld [vmem:[%s2018_s1 + $0x8] sm:$0xff] (!%p138_p3)   ;;  %v1614_v3 = vld [vmem:[%s2018_s1 + $0x10] sm:$0xff] (!%p138_p3)   ;;  %s167_s19 = smul.u32 (!%p138_p3), 56, %s1720_s9  ;;  %vm572_vm0 = vcmask (!%p138_p3), 154624  }
   0x7   : > { %141 = sbr.rel (%p138_p3) target bundleno = 370 (0x172), region = 28  ;;  %664 = vmatprep.subr.bf16.mxu0 (!%p138_p3), %v1730_v1  ;;  %1566 = vmatprep.subr.bf16.mxu1 (!%p138_p3), %v1730_v1  ;;  %v1615_v4 = vld [vmem:[%s2018_s1 + $0x18] sm:$0xff] (!%p138_p3)   ;;  %v1616_v5 = vld [vmem:[%s2018_s1 + $0x20] sm:$0xff] (!%p138_p3)   ;;  %v1617_v8 = vld [vmem:[%s2018_s1 + $0x28] sm:$0xff] (!%p138_p3)   ;;  %vm657_vm1 = vcmask (!%p138_p3), 1040384   ;;  %vm658_vm2 = vcmask (!%p138_p3), 1041408  }
   0x8   : > { %665 = vmatpush1.bf16.msra.mxu0 (!%p138_p3), %v1612_v0  ;;  %1576 = vmatpush1.bf16.msra.mxu1 (!%p138_p3), %v1612_v0  ;;  %p168_p4 = scmp.lt.s32.totalorder (!%p138_p3), %s167_s19, 1567  ;;  %v1618_v9 = vld [vmem:[%s2018_s1 + $0x30] sm:$0xff] (!%p138_p3)   ;;  %v1619_v10 = vld [vmem:[%s2018_s1 + $0x38] sm:$0xff] (!%p138_p3)   ;;  %v1731_v11 = vmov (!%p138_p3), 65535   ;;  %v1620_v13 = vld [vmem:[%s2018_s1 + $0x40] sm:$0xff] (!%p138_p3)   ;;  %vm1201_vm3 = vcmask (!%p138_p3), 519168  }
   0x9   : > { %666 = vmatprep.subr.bf16.mxu0 (!%p138_p3), %v1730_v1  ;;  %1567 = vmatprep.subr.bf16.mxu1 (!%p138_p3), %v1730_v1  ;;  %v659_v12 = vsel (!%p138_p3), %vm657_vm1, 4294967295, %v1731_v11  ;;  %v1621_v14 = vld [vmem:[%s2018_s1 + $0x48] ss:$0 sps:$4 sm:$0x33] (!%p138_p3)  }
   0xa   : > { %v660_v15 = vsel (!%p138_p3), %vm658_vm2, %v659_v12, 0 }
   0xb   : > { %v662_v16 = vand.u32 (!%p138_p3), %v1621_v14, %v660_v15 }
   0xc   : > { %667 = vmatpush1.bf16.msra.mxu0 (!%p138_p3), %v1613_v2  ;;  %1577 = vmatpush1.bf16.msra.mxu1 (!%p138_p3), %v1613_v2 }
   0xd   : > { %668 = vmatprep.subr.bf16.mxu0 (!%p138_p3), %v1730_v1  ;;  %1568 = vmatprep.subr.bf16.mxu1 (!%p138_p3), %v1730_v1 }
   0xe   : > { %s2025_s19 = smov (!%p168_p4, %s167_s19), 1567 }
   0xf   : > { %s1509_s22 = sshll.u32 %s2025_s19, 3  ;;  %s1356_s13 = sshll.u32 %s2025_s19, 2 }
  0x10   : > { %669 = vmatpush1.bf16.msra.mxu0 %v1614_v3  ;;  %1578 = vmatpush1.bf16.msra.mxu1 %v1614_v3  ;;  %s1786_s25 = scalar_lea.vmem %s2017_s0, %s1509_s22  ;;  %s1894_s16 = scalar_lea.vmem %s2019_s2, %s1356_s13 }
  0x11   : > { %670 = vmatprep.subr.bf16.mxu0 %v1730_v1  ;;  %1569 = vmatprep.subr.bf16.mxu1 %v1730_v1  ;;  %v1624_v6 = vld [vmem:[%s1786_s25 + $0x4] ss:$8 sps:$4 sm:$0xff]   ;;  %v1622_v17 = vld [vmem:[%s1786_s25] ss:$8 sps:$4 sm:$0xff]   ;;  %v1628_v19 = vld [vmem:[%s1786_s25 + $0x14] ss:$8 sps:$4 sm:$0xff]  }
  0x12   : > { %v1627_v7 = vld [vmem:[%s1786_s25 + $0xe4] ss:$8 sps:$4 sm:$0xff]   ;;  %1423 = vmatprep.mubr.msk.bf16.mxu0 %vm572_vm0, %v1624_v6  ;;  %v1625_v18 = vld [vmem:[%s1786_s25 + $0xe0] ss:$8 sps:$4 sm:$0xff]   ;;  %v1630_v20 = vld [vmem:[%s1786_s25 + $0xf4] ss:$8 sps:$4 sm:$0xff]  }
  0x13   : > { %1437 = vmatprep.mubr.msk.bf16.mxu1 %vm572_vm0, %v1627_v7  ;;  %v1632_v21 = vld [vmem:[%s1786_s25 + $0x10] ss:$8 sps:$4 sm:$0xff]   ;;  %v1634_v23 = vld [vmem:[%s1786_s25 + $0x24] ss:$8 sps:$4 sm:$0xff]   ;;  %v1638_v25 = vld [vmem:[%s1786_s25 + $0x20] ss:$8 sps:$4 sm:$0xff]  }
  0x14   : > { %671 = vmatpush1.bf16.msra.mxu0 %v1615_v4  ;;  %1579 = vmatpush1.bf16.msra.mxu1 %v1615_v4  ;;  %v1633_v22 = vld [vmem:[%s1786_s25 + $0xf0] ss:$8 sps:$4 sm:$0xff]   ;;  %v1636_v24 = vld [vmem:[%s1786_s25 + $0x104] ss:$8 sps:$4 sm:$0xff]   ;;  %v1639_v26 = vld [vmem:[%s1786_s25 + $0x100] ss:$8 sps:$4 sm:$0xff]  }
  0x15   : > { %672 = vmatprep.subr.bf16.mxu0 %v1730_v1  ;;  %1570 = vmatprep.subr.bf16.mxu1 %v1730_v1  ;;  %v1640_v27 = vld [vmem:[%s1786_s25 + $0x34] ss:$8 sps:$4 sm:$0xff]   ;;  %v1644_v29 = vld [vmem:[%s1786_s25 + $0x30] ss:$8 sps:$4 sm:$0xff]   ;;  %v1646_v31 = vld [vmem:[%s1786_s25 + $0x44] ss:$8 sps:$4 sm:$0xff]  }
  0x16   : > { %v1642_v28 = vld [vmem:[%s1786_s25 + $0x114] ss:$8 sps:$4 sm:$0xff]   ;;  %v1645_v30 = vld [vmem:[%s1786_s25 + $0x110] ss:$8 sps:$4 sm:$0xff]   ;;  %v1648_v32 = vld [vmem:[%s1786_s25 + $0x124] ss:$8 sps:$4 sm:$0xff]  }
  0x17   : > { %v1650_v33 = vld [vmem:[%s1786_s25 + $0x40] ss:$8 sps:$4 sm:$0xff]   ;;  %v1652_v35 = vld [vmem:[%s1786_s25 + $0x54] ss:$8 sps:$4 sm:$0xff]   ;;  %v1656_v37 = vld [vmem:[%s1786_s25 + $0x50] ss:$8 sps:$4 sm:$0xff]  }
  0x18   : > { %673 = vmatpush1.bf16.msra.mxu0 %v1616_v5  ;;  %1580 = vmatpush1.bf16.msra.mxu1 %v1616_v5  ;;  %v1651_v34 = vld [vmem:[%s1786_s25 + $0x120] ss:$8 sps:$4 sm:$0xff]   ;;  %v1654_v36 = vld [vmem:[%s1786_s25 + $0x134] ss:$8 sps:$4 sm:$0xff]   ;;  %v1657_v38 = vld [vmem:[%s1786_s25 + $0x130] ss:$8 sps:$4 sm:$0xff]  }
  0x19   : > { %674 = vmatprep.subr.bf16.mxu0 %v1730_v1  ;;  %1571 = vmatprep.subr.bf16.mxu1 %v1730_v1  ;;  %v1658_v39 = vld [vmem:[%s1786_s25 + $0x64] ss:$8 sps:$4 sm:$0xff]   ;;  %v1662_v41 = vld [vmem:[%s1786_s25 + $0x60] ss:$8 sps:$4 sm:$0xff]   ;;  %v1664_v43 = vld [vmem:[%s1786_s25 + $0x74] ss:$8 sps:$4 sm:$0xff]  }
  0x1a   : > { %v1660_v40 = vld [vmem:[%s1786_s25 + $0x144] ss:$8 sps:$4 sm:$0xff]   ;;  %v1663_v42 = vld [vmem:[%s1786_s25 + $0x140] ss:$8 sps:$4 sm:$0xff]   ;;  %v1666_v44 = vld [vmem:[%s1786_s25 + $0x154] ss:$8 sps:$4 sm:$0xff]  }
  0x1b   : > { %v1668_v45 = vld [vmem:[%s1786_s25 + $0x70] ss:$8 sps:$4 sm:$0xff]   ;;  %v1670_v47 = vld [vmem:[%s1786_s25 + $0x84] ss:$8 sps:$4 sm:$0xff]   ;;  %v1674_v49 = vld [vmem:[%s1786_s25 + $0x80] ss:$8 sps:$4 sm:$0xff]  }
  0x1c   : > { %675 = vmatpush1.bf16.msra.mxu0 %v1617_v8  ;;  %1581 = vmatpush1.bf16.msra.mxu1 %v1617_v8  ;;  %v1669_v46 = vld [vmem:[%s1786_s25 + $0x150] ss:$8 sps:$4 sm:$0xff]   ;;  %v1672_v48 = vld [vmem:[%s1786_s25 + $0x164] ss:$8 sps:$4 sm:$0xff]   ;;  %v1675_v50 = vld [vmem:[%s1786_s25 + $0x160] ss:$8 sps:$4 sm:$0xff]  }
  0x1d   : > { %676 = vmatprep.subr.bf16.mxu0 %v1730_v1  ;;  %1572 = vmatprep.subr.bf16.mxu1 %v1730_v1  ;;  %v1676_v51 = vld [vmem:[%s1786_s25 + $0x94] ss:$8 sps:$4 sm:$0xff]   ;;  %v1680_v53 = vld [vmem:[%s1786_s25 + $0x90] ss:$8 sps:$4 sm:$0xff]   ;;  %v1682_v55 = vld [vmem:[%s1786_s25 + $0xa4] ss:$8 sps:$4 sm:$0xff]  }
  0x1e   : > { %v1678_v52 = vld [vmem:[%s1786_s25 + $0x174] ss:$8 sps:$4 sm:$0xff]   ;;  %v1681_v54 = vld [vmem:[%s1786_s25 + $0x170] ss:$8 sps:$4 sm:$0xff]   ;;  %v1684_v56 = vld [vmem:[%s1786_s25 + $0x184] ss:$8 sps:$4 sm:$0xff]  }
  0x1f   : > { %v1686_v57 = vld [vmem:[%s1786_s25 + $0xa0] ss:$8 sps:$4 sm:$0xff]   ;;  %v1688_v59 = vld [vmem:[%s1786_s25 + $0xb4] ss:$8 sps:$4 sm:$0xff]   ;;  %v1692_v61 = vld [vmem:[%s1786_s25 + $0xb0] ss:$8 sps:$4 sm:$0xff]  }
  0x20   : > { %677 = vmatpush1.bf16.msra.mxu0 %v1618_v9  ;;  %1582 = vmatpush1.bf16.msra.mxu1 %v1618_v9  ;;  %v1687_v58 = vld [vmem:[%s1786_s25 + $0x180] ss:$8 sps:$4 sm:$0xff]   ;;  %v1690_v60 = vld [vmem:[%s1786_s25 + $0x194] ss:$8 sps:$4 sm:$0xff]   ;;  %v1693_v62 = vld [vmem:[%s1786_s25 + $0x190] ss:$8 sps:$4 sm:$0xff]  }
  0x21   : > { %678 = vmatprep.subr.bf16.mxu0 %v1730_v1  ;;  %1573 = vmatprep.subr.bf16.mxu1 %v1730_v1  ;;  %v1694_v63 = vld [vmem:[%s1786_s25 + $0xc4] ss:$8 sps:$4 sm:$0xff]   ;;  %v1699_v2 = vld [vmem:[%s1786_s25 + $0x1a0] ss:$8 sps:$4 sm:$0xff]   ;;  %v1700_v3 = vld [vmem:[%s1786_s25 + $0xd4] ss:$8 sps:$4 sm:$0xff]  }
  0x22   : > { %v1696_v0 = vld [vmem:[%s1786_s25 + $0x1a4] ss:$8 sps:$4 sm:$0xff]   ;;  %v1702_v4 = vld [vmem:[%s1786_s25 + $0x1b4] ss:$8 sps:$4 sm:$0xff]   ;;  %v1704_v5 = vld [vmem:[%s1786_s25 + $0xd0] ss:$8 sps:$4 sm:$0xff]  }
  0x23   : > { %v1705_v6 = vld [vmem:[%s1786_s25 + $0x1b0] ss:$8 sps:$4 sm:$0xff]  }
  0x24   : > { %679 = vmatpush1.bf16.msra.mxu0 %v1619_v10  ;;  %1583 = vmatpush1.bf16.msra.mxu1 %v1619_v10 }
  0x25   : > { %680 = vmatprep.subr.bf16.mxu0 %v1730_v1  ;;  %1574 = vmatprep.subr.bf16.mxu1 %v1730_v1 }
  0x28   : > { %681 = vmatpush1.bf16.msra.mxu0 %v1620_v13  ;;  %1584 = vmatpush1.bf16.msra.mxu1 %v1620_v13 }
  0x29   : > { %682 = vmatprep.subr.bf16.mxu0 %v1730_v1  ;;  %1575 = vmatprep.subr.bf16.mxu1 %v1730_v1  ;;  %v1698_v1 = vld [vmem:[%s1786_s25 + $0xc0] ss:$8 sps:$4 sm:$0xff]  }
  0x2c   : > { %683 = vmatpush1.bf16.msra.mxu0 %v662_v16  ;;  %1585 = vmatpush1.bf16.msra.mxu1 %v662_v16 }
  0x2f   : > { %697 = vmatmul.mubr.bf16.vlgmr.msra.gmra.mrb[0].mxu0 %v1622_v17  ;;  %809 = vmatmul.mubr.bf16.vlgmr.msra.gmra.mrb[0].mxu1 %v1625_v18 }
  0x30   : > { %1424 = vmatprep.mubr.msk.bf16.mxu0 %vm572_vm0, %v1628_v19  ;;  %1438 = vmatprep.mubr.msk.bf16.mxu1 %vm572_vm0, %v1630_v20 }
  0x37   : > { %705 = vmatmul.mubr.bf16.gmra.mrb[4].mxu0 %v1632_v21  ;;  %817 = vmatmul.mubr.bf16.gmra.mrb[4].mxu1 %v1633_v22 }
  0x38   : > { %1425 = vmatprep.mubr.msk.bf16.mxu0 %vm572_vm0, %v1634_v23  ;;  %1439 = vmatprep.mubr.msk.bf16.mxu1 %vm572_vm0, %v1636_v24 }
  0x3f   : > { %713 = vmatmul.mubr.bf16.gmra.mrb[8].mxu0 %v1638_v25  ;;  %825 = vmatmul.mubr.bf16.gmra.mrb[8].mxu1 %v1639_v26 }
  0x40   : > { %1426 = vmatprep.mubr.msk.bf16.mxu0 %vm572_vm0, %v1640_v27  ;;  %1440 = vmatprep.mubr.msk.bf16.mxu1 %vm572_vm0, %v1642_v28 }
  0x47   : > { %721 = vmatmul.mubr.bf16.gmra.mrb[12].mxu0 %v1644_v29  ;;  %833 = vmatmul.mubr.bf16.gmra.mrb[12].mxu1 %v1645_v30 }
  0x48   : > { %1427 = vmatprep.mubr.msk.bf16.mxu0 %vm572_vm0, %v1646_v31  ;;  %1441 = vmatprep.mubr.msk.bf16.mxu1 %vm572_vm0, %v1648_v32 }
  0x4f   : > { %729 = vmatmul.mubr.bf16.gmra.mrb[16].mxu0 %v1650_v33  ;;  %841 = vmatmul.mubr.bf16.gmra.mrb[16].mxu1 %v1651_v34 }
  0x50   : > { %1428 = vmatprep.mubr.msk.bf16.mxu0 %vm572_vm0, %v1652_v35  ;;  %1442 = vmatprep.mubr.msk.bf16.mxu1 %vm572_vm0, %v1654_v36 }
  0x57   : > { %737 = vmatmul.mubr.bf16.gmra.mrb[20].mxu0 %v1656_v37  ;;  %849 = vmatmul.mubr.bf16.gmra.mrb[20].mxu1 %v1657_v38 }
  0x58   : > { %1429 = vmatprep.mubr.msk.bf16.mxu0 %vm572_vm0, %v1658_v39  ;;  %1443 = vmatprep.mubr.msk.bf16.mxu1 %vm572_vm0, %v1660_v40 }
  0x5f   : > { %745 = vmatmul.mubr.bf16.gmra.mrb[24].mxu0 %v1662_v41  ;;  %857 = vmatmul.mubr.bf16.gmra.mrb[24].mxu1 %v1663_v42 }
  0x60   : > { %1430 = vmatprep.mubr.msk.bf16.mxu0 %vm572_vm0, %v1664_v43  ;;  %1444 = vmatprep.mubr.msk.bf16.mxu1 %vm572_vm0, %v1666_v44 }
  0x67   : > { %753 = vmatmul.mubr.bf16.gmra.mrb[28].mxu0 %v1668_v45  ;;  %865 = vmatmul.mubr.bf16.gmra.mrb[28].mxu1 %v1669_v46 }
  0x68   : > { %1431 = vmatprep.mubr.msk.bf16.mxu0 %vm572_vm0, %v1670_v47  ;;  %1445 = vmatprep.mubr.msk.bf16.mxu1 %vm572_vm0, %v1672_v48 }
  0x6f   : > { %761 = vmatmul.mubr.bf16.gmra.mrb[32].mxu0 %v1674_v49  ;;  %873 = vmatmul.mubr.bf16.gmra.mrb[32].mxu1 %v1675_v50 }
  0x70   : > { %1432 = vmatprep.mubr.msk.bf16.mxu0 %vm572_vm0, %v1676_v51  ;;  %1446 = vmatprep.mubr.msk.bf16.mxu1 %vm572_vm0, %v1678_v52 }
  0x77   : > { %769 = vmatmul.mubr.bf16.gmra.mrb[36].mxu0 %v1680_v53  ;;  %881 = vmatmul.mubr.bf16.gmra.mrb[36].mxu1 %v1681_v54 }
  0x78   : > { %1433 = vmatprep.mubr.msk.bf16.mxu0 %vm572_vm0, %v1682_v55  ;;  %1447 = vmatprep.mubr.msk.bf16.mxu1 %vm572_vm0, %v1684_v56 }
  0x7f   : > { %777 = vmatmul.mubr.bf16.gmra.mrb[40].mxu0 %v1686_v57  ;;  %889 = vmatmul.mubr.bf16.gmra.mrb[40].mxu1 %v1687_v58 }
  0x80   : > { %1434 = vmatprep.mubr.msk.bf16.mxu0 %vm572_vm0, %v1688_v59  ;;  %1448 = vmatprep.mubr.msk.bf16.mxu1 %vm572_vm0, %v1690_v60 }
  0x87   : > { %785 = vmatmul.mubr.bf16.gmra.mrb[44].mxu0 %v1692_v61  ;;  %897 = vmatmul.mubr.bf16.gmra.mrb[44].mxu1 %v1693_v62 }
  0x88   : > { %1435 = vmatprep.mubr.msk.bf16.mxu0 %vm572_vm0, %v1694_v63  ;;  %1449 = vmatprep.mubr.msk.bf16.mxu1 %vm572_vm0, %v1696_v0 }
  0x8f   : > { %793 = vmatmul.mubr.bf16.gmra.mrb[48].mxu0 %v1698_v1  ;;  %905 = vmatmul.mubr.bf16.gmra.mrb[48].mxu1 %v1699_v2 }
  0x90   : > { %1436 = vmatprep.mubr.msk.bf16.mxu0 %vm572_vm0, %v1700_v3  ;;  %1450 = vmatprep.mubr.msk.bf16.mxu1 %vm572_vm0, %v1702_v4 }
  0x97   : > { %801 = vmatmul.mubr.bf16.gmra.mrb[52].mxu0 %v1704_v5  ;;  %913 = vmatmul.mubr.bf16.gmra.mrb[52].mxu1 %v1705_v6 }
 0x102   : > { %v698_v7 = vpop.f32.mrb[0].mxu0  ;;  %v810_v8 = vpop.f32.mrb[0].mxu1 }
 0x103   : > { %v921_v9 = vmax.f32 %v698_v7, 0.0  ;;  %v949_v10 = vmax.f32 %v810_v8, 0.0  ;;  %v700_v11 = vpop.f32.mrb[1].mxu0  ;;  %v812_v12 = vpop.f32.mrb[1].mxu1 }
 0x104   : > { %v701_v13 = vpop.f32.mrb[2].mxu0  ;;  %v813_v14 = vpop.f32.mrb[2].mxu1 }
 0x105   : > { %v1510_v15 = vpack.c.bf16 %v921_v9, %v921_v9  ;;  %v1538_v16 = vpack.c.bf16 %v949_v10, %v949_v10  ;;  %v922_v17 = vmax.f32 %v701_v13, 0.0  ;;  %v950_v18 = vmax.f32 %v813_v14, 0.0  ;;  %v703_v19 = vpop.f32.mrb[3].mxu0  ;;  %v815_v20 = vpop.f32.mrb[3].mxu1 }
 0x107   : > { %1202 = vst.msk [vmem:[%s1894_s16] sm:$0xf] %vm1201_vm3, %v1510_v15  ;;  %1230 = vst.msk [vmem:[%s1894_s16 + $0x70] sm:$0xf] %vm1201_vm3, %v1538_v16  ;;  %v1511_v21 = vpack.c.bf16 %v922_v17, %v922_v17  ;;  %v1539_v22 = vpack.c.bf16 %v950_v18, %v950_v18 }
 0x109   : > { %1203 = vst.msk [vmem:[%s1894_s16 + $0x4] sm:$0xf] %vm1201_vm3, %v1511_v21  ;;  %1231 = vst.msk [vmem:[%s1894_s16 + $0x74] sm:$0xf] %vm1201_vm3, %v1539_v22 }
 0x10a   : > { %v706_v23 = vpop.f32.mrb[4].mxu0  ;;  %v818_v24 = vpop.f32.mrb[4].mxu1 }
 0x10b   : > { %v923_v25 = vmax.f32 %v706_v23, 0.0  ;;  %v951_v26 = vmax.f32 %v818_v24, 0.0  ;;  %v708_v27 = vpop.f32.mrb[5].mxu0  ;;  %v820_v28 = vpop.f32.mrb[5].mxu1 }
 0x10c   : > { %v709_v29 = vpop.f32.mrb[6].mxu0  ;;  %v821_v30 = vpop.f32.mrb[6].mxu1 }
 0x10d   : > { %v1512_v31 = vpack.c.bf16 %v923_v25, %v923_v25  ;;  %v1540_v32 = vpack.c.bf16 %v951_v26, %v951_v26  ;;  %v924_v33 = vmax.f32 %v709_v29, 0.0  ;;  %v952_v34 = vmax.f32 %v821_v30, 0.0  ;;  %v711_v35 = vpop.f32.mrb[7].mxu0  ;;  %v823_v36 = vpop.f32.mrb[7].mxu1 }
 0x10f   : > { %1204 = vst.msk [vmem:[%s1894_s16 + $0x8] sm:$0xf] %vm1201_vm3, %v1512_v31  ;;  %1232 = vst.msk [vmem:[%s1894_s16 + $0x78] sm:$0xf] %vm1201_vm3, %v1540_v32  ;;  %v1513_v37 = vpack.c.bf16 %v924_v33, %v924_v33  ;;  %v1541_v38 = vpack.c.bf16 %v952_v34, %v952_v34 }
 0x111   : > { %1205 = vst.msk [vmem:[%s1894_s16 + $0xc] sm:$0xf] %vm1201_vm3, %v1513_v37  ;;  %1233 = vst.msk [vmem:[%s1894_s16 + $0x7c] sm:$0xf] %vm1201_vm3, %v1541_v38 }
 0x112   : > { %v714_v39 = vpop.f32.mrb[8].mxu0  ;;  %v826_v40 = vpop.f32.mrb[8].mxu1 }
 0x113   : > { %v925_v41 = vmax.f32 %v714_v39, 0.0  ;;  %v953_v42 = vmax.f32 %v826_v40, 0.0  ;;  %v716_v43 = vpop.f32.mrb[9].mxu0  ;;  %v828_v44 = vpop.f32.mrb[9].mxu1 }
 0x114   : > { %v717_v45 = vpop.f32.mrb[10].mxu0  ;;  %v829_v46 = vpop.f32.mrb[10].mxu1 }
 0x115   : > { %v1514_v47 = vpack.c.bf16 %v925_v41, %v925_v41  ;;  %v1542_v48 = vpack.c.bf16 %v953_v42, %v953_v42  ;;  %v926_v49 = vmax.f32 %v717_v45, 0.0  ;;  %v954_v50 = vmax.f32 %v829_v46, 0.0  ;;  %v719_v51 = vpop.f32.mrb[11].mxu0  ;;  %v831_v52 = vpop.f32.mrb[11].mxu1 }
 0x117   : > { %1206 = vst.msk [vmem:[%s1894_s16 + $0x10] sm:$0xf] %vm1201_vm3, %v1514_v47  ;;  %1234 = vst.msk [vmem:[%s1894_s16 + $0x80] sm:$0xf] %vm1201_vm3, %v1542_v48  ;;  %v1515_v53 = vpack.c.bf16 %v926_v49, %v926_v49  ;;  %v1543_v54 = vpack.c.bf16 %v954_v50, %v954_v50 }
 0x119   : > { %1207 = vst.msk [vmem:[%s1894_s16 + $0x14] sm:$0xf] %vm1201_vm3, %v1515_v53  ;;  %1235 = vst.msk [vmem:[%s1894_s16 + $0x84] sm:$0xf] %vm1201_vm3, %v1543_v54 }
 0x11a   : > { %v722_v55 = vpop.f32.mrb[12].mxu0  ;;  %v834_v56 = vpop.f32.mrb[12].mxu1 }
 0x11b   : > { %v927_v57 = vmax.f32 %v722_v55, 0.0  ;;  %v955_v58 = vmax.f32 %v834_v56, 0.0  ;;  %v724_v59 = vpop.f32.mrb[13].mxu0  ;;  %v836_v60 = vpop.f32.mrb[13].mxu1 }
 0x11c   : > { %v725_v61 = vpop.f32.mrb[14].mxu0  ;;  %v837_v62 = vpop.f32.mrb[14].mxu1 }
 0x11d   : > { %v1516_v63 = vpack.c.bf16 %v927_v57, %v927_v57  ;;  %v1544_v0 = vpack.c.bf16 %v955_v58, %v955_v58  ;;  %v928_v1 = vmax.f32 %v725_v61, 0.0  ;;  %v956_v2 = vmax.f32 %v837_v62, 0.0  ;;  %v727_v3 = vpop.f32.mrb[15].mxu0  ;;  %v839_v4 = vpop.f32.mrb[15].mxu1 }
 0x11f   : > { %1208 = vst.msk [vmem:[%s1894_s16 + $0x18] sm:$0xf] %vm1201_vm3, %v1516_v63  ;;  %1236 = vst.msk [vmem:[%s1894_s16 + $0x88] sm:$0xf] %vm1201_vm3, %v1544_v0  ;;  %v1517_v5 = vpack.c.bf16 %v928_v1, %v928_v1  ;;  %v1545_v6 = vpack.c.bf16 %v956_v2, %v956_v2 }
 0x121   : > { %1209 = vst.msk [vmem:[%s1894_s16 + $0x1c] sm:$0xf] %vm1201_vm3, %v1517_v5  ;;  %1237 = vst.msk [vmem:[%s1894_s16 + $0x8c] sm:$0xf] %vm1201_vm3, %v1545_v6 }
 0x122   : > { %v730_v7 = vpop.f32.mrb[16].mxu0  ;;  %v842_v8 = vpop.f32.mrb[16].mxu1 }
 0x123   : > { %v929_v9 = vmax.f32 %v730_v7, 0.0  ;;  %v957_v10 = vmax.f32 %v842_v8, 0.0  ;;  %v732_v11 = vpop.f32.mrb[17].mxu0  ;;  %v844_v12 = vpop.f32.mrb[17].mxu1 }
 0x124   : > { %v733_v13 = vpop.f32.mrb[18].mxu0  ;;  %v845_v14 = vpop.f32.mrb[18].mxu1 }
 0x125   : > { %v1518_v15 = vpack.c.bf16 %v929_v9, %v929_v9  ;;  %v1546_v16 = vpack.c.bf16 %v957_v10, %v957_v10  ;;  %v930_v17 = vmax.f32 %v733_v13, 0.0  ;;  %v958_v18 = vmax.f32 %v845_v14, 0.0  ;;  %v735_v19 = vpop.f32.mrb[19].mxu0  ;;  %v847_v20 = vpop.f32.mrb[19].mxu1 }
 0x127   : > { %1210 = vst.msk [vmem:[%s1894_s16 + $0x20] sm:$0xf] %vm1201_vm3, %v1518_v15  ;;  %1238 = vst.msk [vmem:[%s1894_s16 + $0x90] sm:$0xf] %vm1201_vm3, %v1546_v16  ;;  %v1519_v21 = vpack.c.bf16 %v930_v17, %v930_v17  ;;  %v1547_v22 = vpack.c.bf16 %v958_v18, %v958_v18 }
 0x129   : > { %1211 = vst.msk [vmem:[%s1894_s16 + $0x24] sm:$0xf] %vm1201_vm3, %v1519_v21  ;;  %1239 = vst.msk [vmem:[%s1894_s16 + $0x94] sm:$0xf] %vm1201_vm3, %v1547_v22 }
 0x12a   : > { %v738_v23 = vpop.f32.mrb[20].mxu0  ;;  %v850_v24 = vpop.f32.mrb[20].mxu1 }
 0x12b   : > { %v931_v25 = vmax.f32 %v738_v23, 0.0  ;;  %v959_v26 = vmax.f32 %v850_v24, 0.0  ;;  %v740_v27 = vpop.f32.mrb[21].mxu0  ;;  %v852_v28 = vpop.f32.mrb[21].mxu1 }
 0x12c   : > { %v741_v29 = vpop.f32.mrb[22].mxu0  ;;  %v853_v30 = vpop.f32.mrb[22].mxu1 }
 0x12d   : > { %v1520_v31 = vpack.c.bf16 %v931_v25, %v931_v25  ;;  %v1548_v32 = vpack.c.bf16 %v959_v26, %v959_v26  ;;  %v932_v33 = vmax.f32 %v741_v29, 0.0  ;;  %v960_v34 = vmax.f32 %v853_v30, 0.0  ;;  %v743_v35 = vpop.f32.mrb[23].mxu0  ;;  %v855_v36 = vpop.f32.mrb[23].mxu1 }
 0x12f   : > { %1212 = vst.msk [vmem:[%s1894_s16 + $0x28] sm:$0xf] %vm1201_vm3, %v1520_v31  ;;  %1240 = vst.msk [vmem:[%s1894_s16 + $0x98] sm:$0xf] %vm1201_vm3, %v1548_v32  ;;  %v1521_v37 = vpack.c.bf16 %v932_v33, %v932_v33  ;;  %v1549_v38 = vpack.c.bf16 %v960_v34, %v960_v34 }
 0x131   : > { %1213 = vst.msk [vmem:[%s1894_s16 + $0x2c] sm:$0xf] %vm1201_vm3, %v1521_v37  ;;  %1241 = vst.msk [vmem:[%s1894_s16 + $0x9c] sm:$0xf] %vm1201_vm3, %v1549_v38 }
 0x132   : > { %v746_v39 = vpop.f32.mrb[24].mxu0  ;;  %v858_v40 = vpop.f32.mrb[24].mxu1 }
 0x133   : > { %v933_v41 = vmax.f32 %v746_v39, 0.0  ;;  %v961_v42 = vmax.f32 %v858_v40, 0.0  ;;  %v748_v43 = vpop.f32.mrb[25].mxu0  ;;  %v860_v44 = vpop.f32.mrb[25].mxu1 }
 0x134   : > { %v749_v45 = vpop.f32.mrb[26].mxu0  ;;  %v861_v46 = vpop.f32.mrb[26].mxu1 }
 0x135   : > { %v1522_v47 = vpack.c.bf16 %v933_v41, %v933_v41  ;;  %v1550_v48 = vpack.c.bf16 %v961_v42, %v961_v42  ;;  %v934_v49 = vmax.f32 %v749_v45, 0.0  ;;  %v962_v50 = vmax.f32 %v861_v46, 0.0  ;;  %v751_v51 = vpop.f32.mrb[27].mxu0  ;;  %v863_v52 = vpop.f32.mrb[27].mxu1 }
 0x137   : > { %1214 = vst.msk [vmem:[%s1894_s16 + $0x30] sm:$0xf] %vm1201_vm3, %v1522_v47  ;;  %1242 = vst.msk [vmem:[%s1894_s16 + $0xa0] sm:$0xf] %vm1201_vm3, %v1550_v48  ;;  %v1523_v53 = vpack.c.bf16 %v934_v49, %v934_v49  ;;  %v1551_v54 = vpack.c.bf16 %v962_v50, %v962_v50 }
 0x139   : > { %1215 = vst.msk [vmem:[%s1894_s16 + $0x34] sm:$0xf] %vm1201_vm3, %v1523_v53  ;;  %1243 = vst.msk [vmem:[%s1894_s16 + $0xa4] sm:$0xf] %vm1201_vm3, %v1551_v54 }
 0x13a   : > { %v754_v55 = vpop.f32.mrb[28].mxu0  ;;  %v866_v56 = vpop.f32.mrb[28].mxu1 }
 0x13b   : > { %v935_v57 = vmax.f32 %v754_v55, 0.0  ;;  %v963_v58 = vmax.f32 %v866_v56, 0.0  ;;  %v756_v59 = vpop.f32.mrb[29].mxu0  ;;  %v868_v60 = vpop.f32.mrb[29].mxu1 }
 0x13c   : > { %v757_v61 = vpop.f32.mrb[30].mxu0  ;;  %v869_v62 = vpop.f32.mrb[30].mxu1 }
 0x13d   : > { %v1524_v63 = vpack.c.bf16 %v935_v57, %v935_v57  ;;  %v1552_v0 = vpack.c.bf16 %v963_v58, %v963_v58  ;;  %v936_v1 = vmax.f32 %v757_v61, 0.0  ;;  %v964_v2 = vmax.f32 %v869_v62, 0.0  ;;  %v759_v3 = vpop.f32.mrb[31].mxu0  ;;  %v871_v4 = vpop.f32.mrb[31].mxu1 }
 0x13f   : > { %1216 = vst.msk [vmem:[%s1894_s16 + $0x38] sm:$0xf] %vm1201_vm3, %v1524_v63  ;;  %1244 = vst.msk [vmem:[%s1894_s16 + $0xa8] sm:$0xf] %vm1201_vm3, %v1552_v0  ;;  %v1525_v5 = vpack.c.bf16 %v936_v1, %v936_v1  ;;  %v1553_v6 = vpack.c.bf16 %v964_v2, %v964_v2 }
 0x141   : > { %1217 = vst.msk [vmem:[%s1894_s16 + $0x3c] sm:$0xf] %vm1201_vm3, %v1525_v5  ;;  %1245 = vst.msk [vmem:[%s1894_s16 + $0xac] sm:$0xf] %vm1201_vm3, %v1553_v6 }
 0x142   : > { %v762_v7 = vpop.f32.mrb[32].mxu0  ;;  %v874_v8 = vpop.f32.mrb[32].mxu1 }
 0x143   : > { %v937_v9 = vmax.f32 %v762_v7, 0.0  ;;  %v965_v10 = vmax.f32 %v874_v8, 0.0  ;;  %v764_v11 = vpop.f32.mrb[33].mxu0  ;;  %v876_v12 = vpop.f32.mrb[33].mxu1 }
 0x144   : > { %v765_v13 = vpop.f32.mrb[34].mxu0  ;;  %v877_v14 = vpop.f32.mrb[34].mxu1 }
 0x145   : > { %v1526_v15 = vpack.c.bf16 %v937_v9, %v937_v9  ;;  %v1554_v16 = vpack.c.bf16 %v965_v10, %v965_v10  ;;  %v938_v17 = vmax.f32 %v765_v13, 0.0  ;;  %v966_v18 = vmax.f32 %v877_v14, 0.0  ;;  %v767_v19 = vpop.f32.mrb[35].mxu0  ;;  %v879_v20 = vpop.f32.mrb[35].mxu1 }
 0x147   : > { %1218 = vst.msk [vmem:[%s1894_s16 + $0x40] sm:$0xf] %vm1201_vm3, %v1526_v15  ;;  %1246 = vst.msk [vmem:[%s1894_s16 + $0xb0] sm:$0xf] %vm1201_vm3, %v1554_v16  ;;  %v1527_v21 = vpack.c.bf16 %v938_v17, %v938_v17  ;;  %v1555_v22 = vpack.c.bf16 %v966_v18, %v966_v18 }
 0x149   : > { %1219 = vst.msk [vmem:[%s1894_s16 + $0x44] sm:$0xf] %vm1201_vm3, %v1527_v21  ;;  %1247 = vst.msk [vmem:[%s1894_s16 + $0xb4] sm:$0xf] %vm1201_vm3, %v1555_v22 }
 0x14a   : > { %v770_v23 = vpop.f32.mrb[36].mxu0  ;;  %v882_v24 = vpop.f32.mrb[36].mxu1 }
 0x14b   : > { %v939_v25 = vmax.f32 %v770_v23, 0.0  ;;  %v967_v26 = vmax.f32 %v882_v24, 0.0  ;;  %v772_v27 = vpop.f32.mrb[37].mxu0  ;;  %v884_v28 = vpop.f32.mrb[37].mxu1 }
 0x14c   : > { %v773_v29 = vpop.f32.mrb[38].mxu0  ;;  %v885_v30 = vpop.f32.mrb[38].mxu1 }
 0x14d   : > { %v1528_v31 = vpack.c.bf16 %v939_v25, %v939_v25  ;;  %v1556_v32 = vpack.c.bf16 %v967_v26, %v967_v26  ;;  %v940_v33 = vmax.f32 %v773_v29, 0.0  ;;  %v968_v34 = vmax.f32 %v885_v30, 0.0  ;;  %v775_v35 = vpop.f32.mrb[39].mxu0  ;;  %v887_v36 = vpop.f32.mrb[39].mxu1 }
 0x14f   : > { %1220 = vst.msk [vmem:[%s1894_s16 + $0x48] sm:$0xf] %vm1201_vm3, %v1528_v31  ;;  %1248 = vst.msk [vmem:[%s1894_s16 + $0xb8] sm:$0xf] %vm1201_vm3, %v1556_v32  ;;  %v1529_v37 = vpack.c.bf16 %v940_v33, %v940_v33  ;;  %v1557_v38 = vpack.c.bf16 %v968_v34, %v968_v34 }
 0x151   : > { %1221 = vst.msk [vmem:[%s1894_s16 + $0x4c] sm:$0xf] %vm1201_vm3, %v1529_v37  ;;  %1249 = vst.msk [vmem:[%s1894_s16 + $0xbc] sm:$0xf] %vm1201_vm3, %v1557_v38 }
 0x152   : > { %v778_v39 = vpop.f32.mrb[40].mxu0  ;;  %v890_v40 = vpop.f32.mrb[40].mxu1 }
 0x153   : > { %v941_v41 = vmax.f32 %v778_v39, 0.0  ;;  %v969_v42 = vmax.f32 %v890_v40, 0.0  ;;  %v780_v43 = vpop.f32.mrb[41].mxu0  ;;  %v892_v44 = vpop.f32.mrb[41].mxu1 }
 0x154   : > { %v781_v45 = vpop.f32.mrb[42].mxu0  ;;  %v893_v46 = vpop.f32.mrb[42].mxu1 }
 0x155   : > { %v1530_v47 = vpack.c.bf16 %v941_v41, %v941_v41  ;;  %v1558_v48 = vpack.c.bf16 %v969_v42, %v969_v42  ;;  %v942_v49 = vmax.f32 %v781_v45, 0.0  ;;  %v970_v50 = vmax.f32 %v893_v46, 0.0  ;;  %v783_v51 = vpop.f32.mrb[43].mxu0  ;;  %v895_v52 = vpop.f32.mrb[43].mxu1 }
 0x157   : > { %1222 = vst.msk [vmem:[%s1894_s16 + $0x50] sm:$0xf] %vm1201_vm3, %v1530_v47  ;;  %1250 = vst.msk [vmem:[%s1894_s16 + $0xc0] sm:$0xf] %vm1201_vm3, %v1558_v48  ;;  %v1531_v53 = vpack.c.bf16 %v942_v49, %v942_v49  ;;  %v1559_v54 = vpack.c.bf16 %v970_v50, %v970_v50 }
 0x159   : > { %1223 = vst.msk [vmem:[%s1894_s16 + $0x54] sm:$0xf] %vm1201_vm3, %v1531_v53  ;;  %1251 = vst.msk [vmem:[%s1894_s16 + $0xc4] sm:$0xf] %vm1201_vm3, %v1559_v54 }
 0x15a   : > { %v786_v55 = vpop.f32.mrb[44].mxu0  ;;  %v898_v56 = vpop.f32.mrb[44].mxu1 }
 0x15b   : > { %v943_v57 = vmax.f32 %v786_v55, 0.0  ;;  %v971_v58 = vmax.f32 %v898_v56, 0.0  ;;  %v788_v59 = vpop.f32.mrb[45].mxu0  ;;  %v900_v60 = vpop.f32.mrb[45].mxu1 }
 0x15c   : > { %v789_v61 = vpop.f32.mrb[46].mxu0  ;;  %v901_v62 = vpop.f32.mrb[46].mxu1 }
 0x15d   : > { %v1532_v63 = vpack.c.bf16 %v943_v57, %v943_v57  ;;  %v1560_v0 = vpack.c.bf16 %v971_v58, %v971_v58  ;;  %v944_v1 = vmax.f32 %v789_v61, 0.0  ;;  %v972_v2 = vmax.f32 %v901_v62, 0.0  ;;  %v791_v3 = vpop.f32.mrb[47].mxu0  ;;  %v903_v4 = vpop.f32.mrb[47].mxu1 }
 0x15f   : > { %1224 = vst.msk [vmem:[%s1894_s16 + $0x58] sm:$0xf] %vm1201_vm3, %v1532_v63  ;;  %1252 = vst.msk [vmem:[%s1894_s16 + $0xc8] sm:$0xf] %vm1201_vm3, %v1560_v0  ;;  %v1533_v5 = vpack.c.bf16 %v944_v1, %v944_v1  ;;  %v1561_v6 = vpack.c.bf16 %v972_v2, %v972_v2 }
 0x161   : > { %1225 = vst.msk [vmem:[%s1894_s16 + $0x5c] sm:$0xf] %vm1201_vm3, %v1533_v5  ;;  %1253 = vst.msk [vmem:[%s1894_s16 + $0xcc] sm:$0xf] %vm1201_vm3, %v1561_v6 }
 0x162   : > { %v794_v7 = vpop.f32.mrb[48].mxu0  ;;  %v906_v8 = vpop.f32.mrb[48].mxu1 }
 0x163   : > { %v945_v9 = vmax.f32 %v794_v7, 0.0  ;;  %v973_v10 = vmax.f32 %v906_v8, 0.0  ;;  %v796_v11 = vpop.f32.mrb[49].mxu0  ;;  %v908_v12 = vpop.f32.mrb[49].mxu1 }
 0x164   : > { %v797_v13 = vpop.f32.mrb[50].mxu0  ;;  %v909_v14 = vpop.f32.mrb[50].mxu1 }
 0x165   : > { %v1534_v15 = vpack.c.bf16 %v945_v9, %v945_v9  ;;  %v1562_v16 = vpack.c.bf16 %v973_v10, %v973_v10  ;;  %v946_v17 = vmax.f32 %v797_v13, 0.0  ;;  %v974_v18 = vmax.f32 %v909_v14, 0.0  ;;  %v799_v19 = vpop.f32.mrb[51].mxu0  ;;  %v911_v20 = vpop.f32.mrb[51].mxu1 }
 0x167   : > { %1226 = vst.msk [vmem:[%s1894_s16 + $0x60] sm:$0xf] %vm1201_vm3, %v1534_v15  ;;  %1254 = vst.msk [vmem:[%s1894_s16 + $0xd0] sm:$0xf] %vm1201_vm3, %v1562_v16  ;;  %v1535_v21 = vpack.c.bf16 %v946_v17, %v946_v17  ;;  %v1563_v22 = vpack.c.bf16 %v974_v18, %v974_v18 }
 0x169   : > { %1227 = vst.msk [vmem:[%s1894_s16 + $0x64] sm:$0xf] %vm1201_vm3, %v1535_v21  ;;  %1255 = vst.msk [vmem:[%s1894_s16 + $0xd4] sm:$0xf] %vm1201_vm3, %v1563_v22 }
 0x16a   : > { %v802_v23 = vpop.f32.mrb[52].mxu0  ;;  %v914_v24 = vpop.f32.mrb[52].mxu1 }
 0x16b   : > { %v947_v25 = vmax.f32 %v802_v23, 0.0  ;;  %v975_v26 = vmax.f32 %v914_v24, 0.0  ;;  %v804_v27 = vpop.f32.mrb[53].mxu0  ;;  %v916_v28 = vpop.f32.mrb[53].mxu1 }
 0x16c   : > { %v805_v29 = vpop.f32.mrb[54].mxu0  ;;  %v917_v30 = vpop.f32.mrb[54].mxu1 }
 0x16d   : > { %v1536_v31 = vpack.c.bf16 %v947_v25, %v947_v25  ;;  %v1564_v32 = vpack.c.bf16 %v975_v26, %v975_v26  ;;  %v948_v33 = vmax.f32 %v805_v29, 0.0  ;;  %v976_v34 = vmax.f32 %v917_v30, 0.0  ;;  %v807_v35 = vpop.f32.mrb[55].mxu0  ;;  %v919_v36 = vpop.f32.mrb[55].mxu1 }
 0x16f   : > { %1228 = vst.msk [vmem:[%s1894_s16 + $0x68] sm:$0xf] %vm1201_vm3, %v1536_v31  ;;  %1256 = vst.msk [vmem:[%s1894_s16 + $0xd8] sm:$0xf] %vm1201_vm3, %v1564_v32  ;;  %v1537_v37 = vpack.c.bf16 %v948_v33, %v948_v33  ;;  %v1565_v38 = vpack.c.bf16 %v976_v34, %v976_v34 }
 0x171   : > { %1229 = vst.msk [vmem:[%s1894_s16 + $0x6c] sm:$0xf] %vm1201_vm3, %v1537_v37  ;;  %1257 = vst.msk [vmem:[%s1894_s16 + $0xdc] sm:$0xf] %vm1201_vm3, %v1565_v38 }
 0x172 PF: > { %s12_s11 = sadd.s32 1, %s1728_s11   ;;  %s2020_s9 = smov %s1724_s10 }
 0x173   : > { %p9_p5 = scmp.ge.s32.totalorder %s12_s11, 30   ;;  %s2021_s10 = smov %s2023_s12 }
 0x175   :  { %11 = sbr.rel (!%p9_p5) target bundleno = 2 (0x2), region = 61 }

</bundles_post_ra>
